<compile_context>
chip_gen: v7x
topology: tpu7x:2x2x1
jax: 0.10.0
libtpu: 0.0.40
codegen_flags: <defaults>
</compile_context>

<pallas_src>
import jax
import jax.numpy as jnp
from jax import lax
from jax.experimental import pallas as pl
from jax.experimental.pallas import tpu as pltpu


def _round_up(x, m):
    return (x + m - 1) // m * m


def linear_projector_kernel(dense_ref, ids_ref, w_ref, b_ref, tbl_ref, out_ref):
    # nn.Linear: y = x @ W^T  (weight already transposed to (D, H) in the
    # wrapper -> natural-layout MXU contraction, f32 accumulate).
    proj = jnp.dot(dense_ref[...], w_ref[...],
                   preferred_element_type=jnp.float32)

    # nn.Embedding: gather fused in-kernel as a one-hot MXU matmul against the
    # VMEM-resident table (avoids an (N, H) gathered array in HBM).
    ids = ids_ref[...]                                      # (tile_n, 1) int32
    tile_n = ids.shape[0]
    v = tbl_ref.shape[0]
    onehot = (ids == lax.broadcasted_iota(jnp.int32, (tile_n, v), 1)
              ).astype(jnp.float32)
    emb = jnp.dot(onehot, tbl_ref[...], preferred_element_type=jnp.float32)

    # torch.stack([linear(dense), emb(ids)], 1).sum(1) == proj + emb  (+ bias)
    out_ref[...] = proj + b_ref[...] + emb


def linear_projector(dense, w, b, emb_table, ids, *, tile_n=1024):
    """dense: (N, D) f32, w: (H, D) f32 (PyTorch nn.Linear layout), b: (H,) f32,
       emb_table: (V, H) f32, ids: (N,) int  ->  (N, H) f32."""
    N, D = dense.shape
    H = w.shape[0]

    # Row tile: multiple of 8, no larger than needed, and small enough that the
    # row grid has >= 2 programs when N permits (v7x has 2 TensorCores; the
    # extra ~0.35 us grid step is negligible on 1-TC chips).
    two_core_cap = max(8, _round_up(pl.cdiv(N, 2), 8))
    tile_n = max(8, min(tile_n, _round_up(N, 8), two_core_cap))
    grid = (pl.cdiv(N, tile_n),)

    # One-time parameter-side prep (no padding of the streamed row data and no
    # hidden-dim padding of the output).
    w_t = w.T.astype(jnp.float32)                     # (D, H)
    b2 = b.reshape(1, H).astype(jnp.float32)          # (1, H)
    tbl = emb_table.astype(jnp.float32)               # (V, H)
    ids2 = ids.astype(jnp.int32).reshape(N, 1)        # (N, 1)

    # Generation-dependent VMEM budget (3/4 of physical: ~96 MiB on v5e/v6e,
    # ~48 MiB on v7x).
    try:
        vmem_limit = int(pltpu.get_tpu_info().vmem_capacity_bytes * 3 // 4)
    except Exception:  # pragma: no cover - conservative fallback
        vmem_limit = 32 * 1024 * 1024

    out = pl.pallas_call(
        linear_projector_kernel,
        out_shape=jax.ShapeDtypeStruct((N, H), jnp.float32),
        grid=grid,
        in_specs=[
            # Streamed per-row data (auto double-buffered); partial last tile
            # is masked by Pallas, so no wrapper-side row padding is needed.
            pl.BlockSpec((tile_n, D), lambda i: (i, 0)),       # dense rows
            pl.BlockSpec((tile_n, 1), lambda i: (i, 0)),       # ids
            # Grid-invariant operands: whole-array, single-buffered, resident
            # in VMEM for the entire grid (no per-step DMA, no double buffer).
            pl.BlockSpec(memory_space=pltpu.MemorySpace.VMEM),  # W^T
            pl.BlockSpec(memory_space=pltpu.MemorySpace.VMEM),  # bias
            pl.BlockSpec(memory_space=pltpu.MemorySpace.VMEM),  # emb table
        ],
        out_specs=pl.BlockSpec((tile_n, H), lambda i: (i, 0)),
        compiler_params=pltpu.CompilerParams(
            dimension_semantics=("parallel",),   # shard rows across TCs (v7x)
            vmem_limit_bytes=vmem_limit,
        ),
    )(dense, ids2, w_t, b2, tbl)

    return out


def _xavier_uniform(key, shape):
    # PyTorch nn.init.xavier_uniform_ for a 2-D tensor:
    # fan_out = shape[0], fan_in = shape[1]
    fan_out, fan_in = shape
    bound = (6.0 / (fan_in + fan_out)) ** 0.5
    return jax.random.uniform(key, shape, jnp.float32, -bound, bound)


if __name__ == "__main__":
    key = jax.random.PRNGKey(0)
    k_dense, k_ids, k_w, k_emb = jax.random.split(key, 4)

    N, D_IN, HIDDEN, VOCAB = 8, 16, 32, 10   # VOCAB == ids.max() + 2

    # node data (ndata)
    dense_feat = jax.random.normal(k_dense, (N, D_IN), jnp.float32)     # float32 2-D feature
    id_feat = jax.random.randint(k_ids, (N,), 0, VOCAB - 1, jnp.int32)  # int64 1-D feature (int32 here)

    # parameters (deterministic, matching _init_input_modules init)
    w_lin = _xavier_uniform(k_w, (HIDDEN, D_IN))         # nn.Linear weight
    b_lin = jnp.zeros((HIDDEN,), jnp.float32)            # nn.init.constant_(bias, 0)
    emb_table = _xavier_uniform(k_emb, (VOCAB, HIDDEN))  # nn.Embedding weight

    out = linear_projector(dense_feat, w_lin, b_lin, emb_table, id_feat)
    out = jax.block_until_ready(out)

    # pure-JAX reference of the PyTorch forward
    ref = dense_feat @ w_lin.T + b_lin[None, :] + jnp.take(emb_table, id_feat, axis=0)
    assert out.shape == (N, HIDDEN)
    assert jnp.allclose(out, ref, atol=1e-5, rtol=1e-5)

    print("KERNEL_OK")
</pallas_src>

<mosaic_0001>
module attributes {stable_mosaic.version = 11 : i64} {
  func.func @linear_projector_kernel(%arg0: i32, %arg1: memref<8x16xf32, #tpu.memory_space<vmem>>, %arg2: memref<8x1xi32, #tpu.memory_space<vmem>>, %arg3: memref<16x32xf32, #tpu.memory_space<vmem>>, %arg4: memref<1x32xf32, #tpu.memory_space<vmem>>, %arg5: memref<10x32xf32, #tpu.memory_space<vmem>>, %arg6: memref<8x32xf32, #tpu.memory_space<vmem>>) attributes {dimension_semantics = [#tpu.dimension_semantics<parallel>], iteration_bounds = array<i64: 1>, scalar_prefetch = 0 : i64, scratch_operands = 0 : i64, tpu.core_type = #tpu.core_type<tc>, window_params = [{transform_indices = @transform_0, window_bounds = array<i64: 8, 16>}, {transform_indices = @transform_1, window_bounds = array<i64: 8, 1>}, {pipeline_mode = #tpu.pipeline_mode<synchronous>, transform_indices = @transform_2, window_bounds = array<i64: 16, 32>}, {pipeline_mode = #tpu.pipeline_mode<synchronous>, transform_indices = @transform_3, window_bounds = array<i64: 1, 32>}, {pipeline_mode = #tpu.pipeline_mode<synchronous>, transform_indices = @transform_4, window_bounds = array<i64: 10, 32>}, {transform_indices = @transform_5, window_bounds = array<i64: 8, 32>}]} {
    %c0 = arith.constant 0 : index
    %c0_0 = arith.constant 0 : index
    %0 = vector.load %arg1[%c0, %c0_0] : memref<8x16xf32, #tpu.memory_space<vmem>>, vector<8x16xf32>
    %c0_1 = arith.constant 0 : index
    %c0_2 = arith.constant 0 : index
    %1 = vector.load %arg3[%c0_1, %c0_2] : memref<16x32xf32, #tpu.memory_space<vmem>>, vector<16x32xf32>
    %cst = arith.constant dense<0.000000e+00> : vector<8x32xf32>
    %2 = tpu.matmul %0, %1, %cst {dimension_numbers = #tpu.dot_dimension_numbers<[1], [0], [0], [1], [0, 0, 1, 1], [], []>} : vector<8x16xf32>, vector<16x32xf32>, vector<8x32xf32> -> vector<8x32xf32>
    %c0_3 = arith.constant 0 : index
    %c0_4 = arith.constant 0 : index
    %3 = vector.load %arg2[%c0_3, %c0_4] : memref<8x1xi32, #tpu.memory_space<vmem>>, vector<8x1xi32>
    %4 = tpu.iota {dimensions = array<i32: 1>} : vector<8x10xi32>
    %5 = vector.broadcast %3 : vector<8x1xi32> to vector<8x10xi32>
    %6 = arith.cmpi eq, %5, %4 : vector<8x10xi32>
    %7 = arith.extui %6 : vector<8x10xi1> to vector<8x10xi32>
    %8 = arith.sitofp %7 : vector<8x10xi32> to vector<8x10xf32>
    %c0_5 = arith.constant 0 : index
    %c0_6 = arith.constant 0 : index
    %9 = vector.load %arg5[%c0_5, %c0_6] : memref<10x32xf32, #tpu.memory_space<vmem>>, vector<10x32xf32>
    %cst_7 = arith.constant dense<0.000000e+00> : vector<8x32xf32>
    %10 = tpu.matmul %8, %9, %cst_7 {dimension_numbers = #tpu.dot_dimension_numbers<[1], [0], [0], [1], [0, 0, 1, 1], [], []>} : vector<8x10xf32>, vector<10x32xf32>, vector<8x32xf32> -> vector<8x32xf32>
    %c0_8 = arith.constant 0 : index
    %c0_9 = arith.constant 0 : index
    %11 = vector.load %arg4[%c0_8, %c0_9] : memref<1x32xf32, #tpu.memory_space<vmem>>, vector<1x32xf32>
    %12 = vector.broadcast %11 : vector<1x32xf32> to vector<8x32xf32>
    %13 = arith.addf %2, %12 : vector<8x32xf32>
    %14 = arith.addf %13, %10 : vector<8x32xf32>
    %c0_10 = arith.constant 0 : index
    %c0_11 = arith.constant 0 : index
    %15 = vector.load %arg6[%c0_10, %c0_11] : memref<8x32xf32, #tpu.memory_space<vmem>>, vector<8x32xf32>
    tpu.vector_store %arg6[%c0_10, %c0_11], %14 {strides = array<i32>} : memref<8x32xf32, #tpu.memory_space<vmem>>, vector<8x32xf32>,
    return
  }
  func.func @transform_0(%arg0: i32) -> (i32, i32) {
    %c0_i32 = arith.constant 0 : i32
    %c0_i32_0 = arith.constant 0 : i32
    return %arg0, %c0_i32 : i32, i32
  }
  func.func @transform_1(%arg0: i32) -> (i32, i32) {
    %c0_i32 = arith.constant 0 : i32
    %c0_i32_0 = arith.constant 0 : i32
    return %arg0, %c0_i32 : i32, i32
  }
  func.func @transform_2(%arg0: i32) -> (i32, i32) {
    %c0_i32 = arith.constant 0 : i32
    %c0_i32_0 = arith.constant 0 : i32
    %c0_i32_1 = arith.constant 0 : i32
    return %c0_i32, %c0_i32_0 : i32, i32
  }
  func.func @transform_3(%arg0: i32) -> (i32, i32) {
    %c0_i32 = arith.constant 0 : i32
    %c0_i32_0 = arith.constant 0 : i32
    %c0_i32_1 = arith.constant 0 : i32
    return %c0_i32, %c0_i32_0 : i32, i32
  }
  func.func @transform_4(%arg0: i32) -> (i32, i32) {
    %c0_i32 = arith.constant 0 : i32
    %c0_i32_0 = arith.constant 0 : i32
    %c0_i32_1 = arith.constant 0 : i32
    return %c0_i32, %c0_i32_0 : i32, i32
  }
  func.func @transform_5(%arg0: i32) -> (i32, i32) {
    %c0_i32 = arith.constant 0 : i32
    %c0_i32_0 = arith.constant 0 : i32
    return %arg0, %c0_i32 : i32, i32
  }
}

</mosaic_0001>

<bundles_post_ra>
// kernel: tpu_custom_call.1
= control target key start
LH: loop header
LB: loop body
LE: loop exit
PB: predicated region body
PF: predicated region fallthrough
CT: control target
= control target key end

     0   :  { %10 = vsyncpa [#allocation3], 0  ;;  %s451_s0 = inlined_call_operand.hbm [shape: f32[8,16], index: 0, kind: input, shape index: {}]   ;;  %s452_s1 = inlined_call_operand.vmem [shape: s32[8,1], index: 1, kind: input, shape index: {}]   ;;  %s453_s2 = inlined_call_operand.vmem [shape: f32[16,32], index: 2, kind: input, shape index: {}]   ;;  %s454_s3 = inlined_call_operand.vmem [shape: f32[1,32], index: 3, kind: input, shape index: {}]   ;;  %s455_s4 = inlined_call_operand.hbm [shape: f32[10,32], index: 4, kind: input, shape index: {}]   ;;  %s456_s5 = inlined_call_operand.hbm [shape: f32[8,32], index: 5, kind: output, shape index: {}]  }
   0x1   :  { %11 = vsyncpa [#allocation6], 0 }
   0x2   :  { %12 = vsyncpa [#allocation4], 0  ;;  %s356_s18 = smov [#allocation2]   ;;  %s357_s20 = smov [#allocation5]  }
   0x3   :  { %s19_s19 = sshll.u32 %s356_s18, 4  ;;  %s34_s21 = sshll.u32 %s357_s20, 4  ;;  %s20_s19 = int_to_ptr.vmem [resolvable:$true] %s19_s19  ;;  %s396_s21 = int_to_ptr.vmem [resolvable:$true] %s34_s21 }
   0x4   :  { %s284_s24 = scalar_lea.hbm %s451_s0, 128 }
   0x5   :  { %p285_p0 = scmp.ne.s32.totalorder %s451_s0, %s284_s24  ;;  %p288_p1 = scmp.lt.u32.totalorder %s284_s24, %s451_s0 }
   0x7   :  { %p290_p2 = pnand %p288_p1, %p285_p0 }
   0x9   :  { %293 = shalt.err (!%p290_p2)
}
   0xa   :  { %s294_s29 = scalar_lea.vmem %s20_s19, 128  ;;  %p299_p4 = scmp.lt.s32.totalorder %s20_s19, %s20_s19 }
   0xb   :  { %p295_p3 = scmp.ne.s32.totalorder %s20_s19, %s294_s29  ;;  %p300_p5 = scmp.lt.s32.totalorder %s294_s29, %s294_s29 }
   0xd   :  { %p301_p6 = por %p300_p5, %p299_p4 }
   0xf   :  { %p302_p7 = pnand %p301_p6, %p295_p3 }
  0x11   :  { %305 = shalt.err (!%p302_p7)
}
  0x12   :  { %22 = dma.hbm_to_vmem [thread:$0]  %s451_s0, 128, %s20_s19, [#allocation3]  }
  0x13   :  { %s306_s9 = scalar_lea.hbm %s455_s4, 256 }
  0x14   :  { %p307_p8 = scmp.ne.s32.totalorder %s455_s4, %s306_s9  ;;  %p310_p9 = scmp.lt.u32.totalorder %s306_s9, %s455_s4 }
  0x16   :  { %p312_p10 = pnand %p310_p9, %p307_p8 }
  0x18   :  { %315 = shalt.err (!%p312_p10)
}
  0x19   :  { %s316_s14 = scalar_lea.vmem %s396_s21, 256  ;;  %p321_p12 = scmp.lt.s32.totalorder %s396_s21, %s396_s21 }
  0x1a   :  { %p317_p11 = scmp.ne.s32.totalorder %s396_s21, %s316_s14  ;;  %p322_p13 = scmp.lt.s32.totalorder %s316_s14, %s316_s14 }
  0x1c   :  { %p323_p0 = por %p322_p13, %p321_p12 }
  0x1e   :  { %p324_p1 = pnand %p323_p0, %p317_p11 }
  0x20   :  { %327 = shalt.err (!%p324_p1)
}
  0x21   :  { %s358_s0 = smov 128   ;;  %s359_s15 = smov 8  }
  0x22   :  { %40 = dma.hbm_to_vmem [thread:$0]  %s455_s4, 256, %s396_s21, [#allocation6], %s358_s0, %s358_s0, %s359_s15  }
  0x23   :  { %350 = dma.done.wait [#allocation3], 128  }
  0x24   :  { %351 = vsyncadd [#allocation3], 4294967168 }
  0x25   :  { %352 = dma.done.wait [#allocation6], 256  }
  0x26   :  { %353 = vsyncadd [#allocation6], 4294967040  ;;  %v360_v0 = vmov 0   ;;  %v361_v1 = vmov 0.0|0.0   ;;  %vm65_vm0 = vcmask 1041408   ;;  %vm362_vm1 = vmmov 1  }
  0x27   :  { %283 = vset.pattern.permute.xlu0 %v360_v0  ;;  %264 = vmatprep.subr.bf16.mxu1 %v361_v1  ;;  %vm266_vm2 = vmpackc.low %vm65_vm0, %vm362_vm1  ;;  %v50_v2 = vld [vmem:[%s452_s1] sm:$0xff]  ;;  %v59_v3 = vld [vmem:[#allocation5] sm:$0xff]  ;;  %vm363_vm3 = vmmov 0   ;;  %v364_v9 = vmov 0.0   ;;  %vm146_vm4 = vcmask 130048   ;;  %v51_v11 = vlaneseq  ;;  %s365_s23 = smov [#allocation7]  }
  0x28   :  { %268 = vmatprep.subr.bf16.mxu0 %v361_v1  ;;  %v60_v4 = vld [vmem:[#allocation5 + $0x8] sm:$0x3]  ;;  %54 = vperm.xlu0 %283, %v50_v2   ;;  %v48_v6 = vld [vmem:[%s453_s2] sm:$0xff]  ;;  %v49_v7 = vld [vmem:[%s453_s2 + $0x8] sm:$0xff]  ;;  %vm61_vm5 = vcmask 80896   ;;  %s229_s24 = sshll.u32 %s365_s23, 4  ;;  %s230_s24 = int_to_ptr.vmem [resolvable:$true] %s229_s24 }
  0x29   :  { %v265_v5 = vpack.c.bf16 %v60_v4, %v59_v3  ;;  %v269_v8 = vpack.c.bf16 %v49_v7, %v48_v6  ;;  %254 = vmatprep.mubr.msk.f32.mxu1 %vm363_vm3, %v364_v9  ;;  %261 = vmatprep.mubr.msk.f32.mxu0 %vm363_vm3, %v364_v9  ;;  %v47_v10 = vld [vmem:[#allocation2] sm:$0xff]  ;;  %v52_v12 = vand.u32 127, %v51_v11  ;;  %vm221_vm7 = vcmask 261120   ;;  %s328_s25 = scalar_lea.vmem %s230_s24, 128  ;;  %p333_p3 = scmp.lt.s32.totalorder %s230_s24, %s230_s24 }
  0x2a   :  { %v242_v17 = vld [vmem:[%s454_s3] ss:$0 sm:$0xff]  ;;  %p329_p2 = scmp.ne.s32.totalorder %s230_s24, %s328_s25  ;;  %p334_p4 = scmp.lt.s32.totalorder %s328_s25, %s328_s25 }
  0x2b   :  { %267 = vmatpush3.bf16.msk.msra.mxu1 %vm266_vm2, %v265_v5  ;;  %270 = vmatpush3.bf16.msra.mxu0 %v269_v8 }
  0x2c   :  { %p335_p5 = por %p334_p4, %p333_p3 }
  0x2e   :  { %262 = vmatmul.mubr.msk.f32.vlgmr.msra.gmra.mrb[0].mxu0 %vm146_vm4, %v47_v10  ;;  %p336_p6 = pnand %p335_p5, %p329_p2 }
  0xa7   :  { %v55_v13 = vpop.permute.xlu0 %54 }
  0xa8   :  { %vm56_vm6 = vcmp.eq.s32.totalorder %v55_v13, %v52_v12 }
  0xa9   :  { %v239_v14 = vsel %vm56_vm6, 1.0, %v364_v9 }
  0xaa   :  { %255 = vmatmul.mubr.msk.f32.vlgmr.msra.gmra.mrb[0].mxu1 %vm61_vm5, %v239_v14 }
 0x101   :  { %v216_v15 = vpop.f32.mrb[0].mxu0 }
 0x102   :  { %v263_v16 = vpop.f32.mrb[1].mxu0 }
 0x17d   :  { %v135_v18 = vpop.f32.mrb[0].mxu1 }
 0x17e   :  { %v271_v19 = vadd.f32 %v242_v17, %v135_v18  ;;  %v256_v20 = vpop.f32.mrb[1].mxu1 }
 0x180   :  { %v272_v21 = vadd.f32 %v271_v19, %v216_v15 }
 0x182   :  { %222 = vst.msk [vmem:[#allocation7] sm:$0xff] %vm221_vm7, %v272_v21 }
 0x183   :  { %339 = shalt.err (!%p336_p6)
}
 0x184   :  { %s340_s3 = scalar_lea.hbm %s456_s5, 128 }
 0x185   :  { %p341_p7 = scmp.ne.s32.totalorder %s456_s5, %s340_s3  ;;  %p344_p8 = scmp.lt.u32.totalorder %s340_s3, %s456_s5 }
 0x187   :  { %p346_p9 = pnand %p344_p8, %p341_p7 }
 0x189   :  { %349 = shalt.err (!%p346_p9)
}
 0x18a   :  { %232 = dma.vmem_to_hbm [thread:$0]  %s230_s24, 128, %s456_s5, [#allocation4]  }
 0x18b   :  { %354 = dma.done.wait [#allocation4], 128  }
 0x18c   :  { %355 = vsyncadd [#allocation4], 4294967168 }
 0x18d   :  { %236 = vsyncpa [#allocation3], 1 }
 0x18e   :  { %237 = vsyncpa [#allocation6], 1 }
 0x18f   :  { %238 = vsyncpa [#allocation4], 1 }

</bundles_post_ra>
